<compile_context>
chip_gen: v6e
topology: v6e:2x2x1
jax: 0.10.0
libtpu: 0.0.40
codegen_flags: <defaults>
</compile_context>

<pallas_src>
import numpy as np
import jax
import jax.numpy as jnp
from jax import lax
from jax.experimental import pallas as pl
from jax.experimental.pallas import tpu as pltpu


# ----------------------------------------------------------------------------
# Parameter packing: one small f32 tile, sliced statically inside the kernel.
#   rows [0, H)     : [ w1 (H, F) | b1 (H, 1) | 0-pad ]
#   rows [H, H + F) : [ w2 (F, H) | b2 (F, 1) | 0-pad ]
# ----------------------------------------------------------------------------
def _pack_params(w1, b1, w2, b2):
    hidden, num_fields = w1.shape
    cols = max(num_fields, hidden) + 1
    p = jnp.zeros((hidden + num_fields, cols), jnp.float32)
    p = p.at[:hidden, :num_fields].set(w1.astype(jnp.float32))
    p = p.at[:hidden, num_fields].set(b1.astype(jnp.float32))
    p = p.at[hidden:, :hidden].set(w2.astype(jnp.float32))
    p = p.at[hidden:, hidden].set(b2.astype(jnp.float32))
    return p


def _choose_tile_j(num_fields, batch, dim, vmem_budget_bytes=8 << 20):
    """Largest tile of the broadcast (j) axis whose lane-dense output block fits.

    The per-step output block is (F, tile_j*B*D); blocks smaller than the full
    output must keep the last dim a multiple of 128.  ~3x the block (double-
    buffered output + the in-register slab) must stay under the VMEM budget.
    """
    bd = batch * dim
    for t in range(batch, 0, -1):
        if batch % t:
            continue
        lanes_ok = (t == batch) or ((t * bd) % 128 == 0)
        fits = 3 * num_fields * t * bd * 4 <= vmem_budget_bytes
        if lanes_ok and fits:
            return t
    return batch  # toy shapes never hit this fallback


# ----------------------------------------------------------------------------
# Fused kernel: squeeze (mean over D) + excitation MLP + dense weighting store.
#   e2_ref : (F, B*D)            flattened stacked embeddings
#   p_ref  : (H+F, max(F,H)+1)   packed (w1 | b1) / (w2 | b2)
#   out_ref: (F, tile_j*B*D)     out[f, jj*B*D + b*D + d] = exc[f, j0+jj] * emb_f[b, d]
#   (reproduces PyTorch's (B, D) * (B, 1, 1) -> (B, B, D) broadcast exactly)
# ----------------------------------------------------------------------------
def _make_kernel(num_fields, hidden, batch, dim, tile_j):
    bd = batch * dim
    out_lanes = tile_j * bd

    def kernel(e2_ref, p_ref, out_ref):
        j0 = pl.program_id(0) * tile_j            # first broadcast row of this tile

        e2 = e2_ref[...]                          # (F, B*D)

        # -- squeeze: per-field mean over D as one constant matmul (no XLU reduce)
        #    avg_mat[x, b] = 1/D  iff  b*D <= x < (b+1)*D   (iota-built, no DMA)
        r = lax.broadcasted_iota(jnp.int32, (bd, batch), 0)
        c = lax.broadcasted_iota(jnp.int32, (bd, batch), 1)
        avg_mat = jnp.where((r >= c * dim) & (r < (c + 1) * dim),
                            jnp.float32(1.0 / dim), jnp.float32(0.0))
        avgs_t = jnp.dot(e2, avg_mat, preferred_element_type=jnp.float32)   # (F, B)

        # -- excitation MLP, transposed (W @ x^T == (x @ W^T)^T); one packed tile
        p = p_ref[...]
        w1 = p[0:hidden, 0:num_fields]                                      # (H, F)
        b1 = p[0:hidden, num_fields:num_fields + 1]                         # (H, 1)
        w2 = p[hidden:hidden + num_fields, 0:hidden]                        # (F, H)
        b2 = p[hidden:hidden + num_fields, hidden:hidden + 1]               # (F, 1)

        z1 = jnp.dot(w1, avgs_t, preferred_element_type=jnp.float32) + b1   # (H, B)
        z1 = z1 * jax.nn.sigmoid(z1)                                        # SiLU
        z2 = jnp.dot(w2, z1, preferred_element_type=jnp.float32) + b2       # (F, B)
        exc = jax.nn.sigmoid(z2)                                            # (F, B) = excitation^T

        # -- weighting: selector matmul builds the whole (F, tile_j*B*D) weight
        #    slab, then ONE dense unmasked store (no per-j masked partial stores).
        #    sel[j, jj*B*D + x] = 1  iff  j == j0 + jj
        jr = lax.broadcasted_iota(jnp.int32, (batch, out_lanes), 0)
        cc = lax.broadcasted_iota(jnp.int32, (batch, out_lanes), 1)
        rel = jr - j0
        sel = jnp.where((cc >= rel * bd) & (cc < (rel + 1) * bd),
                        jnp.float32(1.0), jnp.float32(0.0))
        w_slab = jnp.dot(exc, sel, preferred_element_type=jnp.float32)      # (F, tile_j*B*D)

        e2_tiled = e2 if tile_j == 1 else jnp.concatenate([e2] * tile_j, axis=1)
        out_ref[...] = w_slab * e2_tiled

    return kernel


def se_block_forward(embeddings, w1, b1, w2, b2):
    """embeddings: list of F arrays, each (B, D) float32.

    Returns a stacked (F, B, B, D) float32 array; out[i] equals the i-th element
    of the PyTorch module's returned list (exact (B,1,1)-broadcast semantics:
    out[i, j, b, d] = excitation[j, i] * embeddings[i][b, d]).
    """
    num_fields = len(embeddings)
    batch, dim = embeddings[0].shape
    hidden = w1.shape[0]
    bd = batch * dim

    e2 = jnp.stack(embeddings, axis=0).astype(jnp.float32).reshape(num_fields, bd)
    params = _pack_params(w1, b1, w2, b2)

    tile_j = _choose_tile_j(num_fields, batch, dim)
    grid = (batch // tile_j,)
    kernel = _make_kernel(num_fields, hidden, batch, dim, tile_j)

    out_flat = pl.pallas_call(
        kernel,
        out_shape=jax.ShapeDtypeStruct((num_fields, batch * bd), jnp.float32),
        grid_spec=pltpu.PrefetchScalarGridSpec(
            num_scalar_prefetch=0,
            grid=grid,
            in_specs=[
                pl.BlockSpec((num_fields, bd), lambda jb: (0, 0)),
                pl.BlockSpec(params.shape, lambda jb: (0, 0)),
            ],
            out_specs=pl.BlockSpec((num_fields, tile_j * bd), lambda jb: (0, jb)),
        ),
        # Broadcast axis is independent per step -> "parallel" (lets v7x's two
        # TensorCores split it once B grows; at toy shapes the grid is (1,)).
        compiler_params=pltpu.CompilerParams(
            dimension_semantics=("parallel",)),
    )(e2, params)

    # Free reshape back to the logical (F, B, B, D) layout (identical bytes).
    return out_flat.reshape(num_fields, batch, batch, dim)


# ----------------------------------------------------------------------------
# Pure-JAX reference (mirrors the PyTorch forward line by line)
# ----------------------------------------------------------------------------
def se_block_reference(embeddings, w1, b1, w2, b2):
    field_avgs = jnp.stack([e.mean(axis=1) for e in embeddings], axis=1)   # (B, F)
    squeeze = field_avgs @ w1.T + b1                                       # fc1
    squeeze = jax.nn.silu(squeeze)                                         # SiLU
    excitation = jax.nn.sigmoid(squeeze @ w2.T + b2)                       # (B, F)
    outs = []
    for i, emb in enumerate(embeddings):
        weight = excitation[:, i][:, None]                                 # (B, 1)
        # emb (B, D) * (B, 1, 1) -> (B, B, D)  (same broadcast as torch)
        outs.append(emb[None, :, :] * weight[:, :, None])
    return outs


if __name__ == "__main__":
    # Module config: field_dims has F entries; reduction_ratio=4 -> hidden = F//4
    field_dims = [100] * 8
    num_fields = len(field_dims)            # F = 8
    reduction_ratio = 4
    hidden = num_fields // reduction_ratio  # H = 2
    batch, dim = 4, 16                      # each embedding: (B=4, D=16)

    key = jax.random.PRNGKey(0)
    kw1, kb1, kw2, kb2, kemb = jax.random.split(key, 5)

    # Deterministic nn.Linear-style init (uniform +/- 1/sqrt(fan_in))
    bound1 = 1.0 / np.sqrt(num_fields)
    w1 = jax.random.uniform(kw1, (hidden, num_fields), jnp.float32, -bound1, bound1)
    b1 = jax.random.uniform(kb1, (hidden,), jnp.float32, -bound1, bound1)
    bound2 = 1.0 / np.sqrt(hidden)
    w2 = jax.random.uniform(kw2, (num_fields, hidden), jnp.float32, -bound2, bound2)
    b2 = jax.random.uniform(kb2, (num_fields,), jnp.float32, -bound2, bound2)

    emb_keys = jax.random.split(kemb, num_fields)
    embeddings = [jax.random.normal(k, (batch, dim), jnp.float32) for k in emb_keys]

    out = se_block_forward(embeddings, w1, b1, w2, b2)
    out = jax.block_until_ready(out)

    refs = se_block_reference(embeddings, w1, b1, w2, b2)
    ref_stacked = np.stack([np.asarray(r) for r in refs], axis=0)
    assert out.shape == (num_fields, batch, batch, dim)
    np.testing.assert_allclose(np.asarray(out), ref_stacked, rtol=1e-5, atol=1e-5)

    print("KERNEL_OK")
</pallas_src>

<mosaic_0001>
module attributes {stable_mosaic.version = 11 : i64} {
  func.func @kernel(%arg0: i32, %arg1: memref<8x64xf32, #tpu.memory_space<vmem>>, %arg2: memref<10x9xf32, #tpu.memory_space<vmem>>, %arg3: memref<8x256xf32, #tpu.memory_space<vmem>>) attributes {dimension_semantics = [#tpu.dimension_semantics<parallel>], iteration_bounds = array<i64: 1>, scalar_prefetch = 0 : i64, scratch_operands = 0 : i64, tpu.core_type = #tpu.core_type<tc>, window_params = [{pipeline_mode = #tpu.pipeline_mode<synchronous>, transform_indices = @transform_0, window_bounds = array<i64: 8, 64>}, {pipeline_mode = #tpu.pipeline_mode<synchronous>, transform_indices = @transform_1, window_bounds = array<i64: 10, 9>}, {transform_indices = @transform_2, window_bounds = array<i64: 8, 256>}]} {
    %c4_i32 = arith.constant 4 : i32
    %0 = arith.muli %arg0, %c4_i32 : i32
    %c0 = arith.constant 0 : index
    %c0_0 = arith.constant 0 : index
    %1 = vector.load %arg1[%c0, %c0_0] : memref<8x64xf32, #tpu.memory_space<vmem>>, vector<8x64xf32>
    %2 = tpu.iota {dimensions = array<i32: 0>} : vector<64x4xi32>
    %3 = tpu.iota {dimensions = array<i32: 1>} : vector<64x4xi32>
    %c16_i32 = arith.constant 16 : i32
    %4 = vector.broadcast %c16_i32 : i32 to vector<64x4xi32>
    %5 = arith.muli %3, %4 : vector<64x4xi32>
    %6 = arith.cmpi sge, %2, %5 : vector<64x4xi32>
    %c1_i32 = arith.constant 1 : i32
    %7 = vector.broadcast %c1_i32 : i32 to vector<64x4xi32>
    %8 = arith.addi %3, %7 : vector<64x4xi32>
    %c16_i32_1 = arith.constant 16 : i32
    %9 = vector.broadcast %c16_i32_1 : i32 to vector<64x4xi32>
    %10 = arith.muli %8, %9 : vector<64x4xi32>
    %11 = arith.cmpi slt, %2, %10 : vector<64x4xi32>
    %12 = arith.andi %6, %11 : vector<64x4xi1>
    %cst = arith.constant 6.250000e-02 : f32
    %cst_2 = arith.constant 0.000000e+00 : f32
    %13 = vector.broadcast %cst : f32 to vector<64x4xf32>
    %14 = vector.broadcast %cst_2 : f32 to vector<64x4xf32>
    %15 = arith.select %12, %13, %14 : vector<64x4xi1>, vector<64x4xf32>
    %cst_3 = arith.constant dense<0.000000e+00> : vector<8x4xf32>
    %16 = tpu.matmul %1, %15, %cst_3 {dimension_numbers = #tpu.dot_dimension_numbers<[1], [0], [0], [1], [0, 0, 1, 1], [], []>} : vector<8x64xf32>, vector<64x4xf32>, vector<8x4xf32> -> vector<8x4xf32>
    %c0_4 = arith.constant 0 : index
    %c0_5 = arith.constant 0 : index
    %17 = vector.load %arg2[%c0_4, %c0_5] : memref<10x9xf32, #tpu.memory_space<vmem>>, vector<10x9xf32>
    %18 = vector.extract_strided_slice %17 {offsets = [0, 0], sizes = [2, 8], strides = [1, 1]} : vector<10x9xf32> to vector<2x8xf32>
    %19 = vector.extract_strided_slice %17 {offsets = [0, 8], sizes = [2, 1], strides = [1, 1]} : vector<10x9xf32> to vector<2x1xf32>
    %20 = vector.extract_strided_slice %17 {offsets = [2, 0], sizes = [8, 2], strides = [1, 1]} : vector<10x9xf32> to vector<8x2xf32>
    %21 = vector.extract_strided_slice %17 {offsets = [2, 2], sizes = [8, 1], strides = [1, 1]} : vector<10x9xf32> to vector<8x1xf32>
    %cst_6 = arith.constant dense<0.000000e+00> : vector<2x4xf32>
    %22 = tpu.matmul %18, %16, %cst_6 {dimension_numbers = #tpu.dot_dimension_numbers<[1], [0], [0], [1], [0, 0, 1, 1], [], []>} : vector<2x8xf32>, vector<8x4xf32>, vector<2x4xf32> -> vector<2x4xf32>
    %23 = vector.broadcast %19 : vector<2x1xf32> to vector<2x4xf32>
    %24 = arith.addf %22, %23 : vector<2x4xf32>
    %25 = arith.negf %24 : vector<2x4xf32>
    %26 = math.exp %25 : vector<2x4xf32>
    %cst_7 = arith.constant 1.000000e+00 : f32
    %27 = vector.broadcast %cst_7 : f32 to vector<2x4xf32>
    %28 = arith.addf %27, %26 : vector<2x4xf32>
    %29 = arith.divf %27, %28 : vector<2x4xf32>
    %30 = arith.mulf %24, %29 : vector<2x4xf32>
    %cst_8 = arith.constant dense<0.000000e+00> : vector<8x4xf32>
    %31 = tpu.matmul %20, %30, %cst_8 {dimension_numbers = #tpu.dot_dimension_numbers<[1], [0], [0], [1], [0, 0, 1, 1], [], []>} : vector<8x2xf32>, vector<2x4xf32>, vector<8x4xf32> -> vector<8x4xf32>
    %32 = vector.broadcast %21 : vector<8x1xf32> to vector<8x4xf32>
    %33 = arith.addf %31, %32 : vector<8x4xf32>
    %34 = arith.negf %33 : vector<8x4xf32>
    %35 = math.exp %34 : vector<8x4xf32>
    %cst_9 = arith.constant 1.000000e+00 : f32
    %36 = vector.broadcast %cst_9 : f32 to vector<8x4xf32>
    %37 = arith.addf %36, %35 : vector<8x4xf32>
    %38 = arith.divf %36, %37 : vector<8x4xf32>
    %39 = tpu.iota {dimensions = array<i32: 0>} : vector<4x256xi32>
    %40 = tpu.iota {dimensions = array<i32: 1>} : vector<4x256xi32>
    %41 = vector.broadcast %0 : i32 to vector<4x256xi32>
    %42 = arith.subi %39, %41 : vector<4x256xi32>
    %c64_i32 = arith.constant 64 : i32
    %43 = vector.broadcast %c64_i32 : i32 to vector<4x256xi32>
    %44 = arith.muli %42, %43 : vector<4x256xi32>
    %45 = arith.cmpi sge, %40, %44 : vector<4x256xi32>
    %c1_i32_10 = arith.constant 1 : i32
    %46 = vector.broadcast %c1_i32_10 : i32 to vector<4x256xi32>
    %47 = arith.addi %42, %46 : vector<4x256xi32>
    %c64_i32_11 = arith.constant 64 : i32
    %48 = vector.broadcast %c64_i32_11 : i32 to vector<4x256xi32>
    %49 = arith.muli %47, %48 : vector<4x256xi32>
    %50 = arith.cmpi slt, %40, %49 : vector<4x256xi32>
    %51 = arith.andi %45, %50 : vector<4x256xi1>
    %cst_12 = arith.constant 1.000000e+00 : f32
    %cst_13 = arith.constant 0.000000e+00 : f32
    %52 = vector.broadcast %cst_12 : f32 to vector<4x256xf32>
    %53 = vector.broadcast %cst_13 : f32 to vector<4x256xf32>
    %54 = arith.select %51, %52, %53 : vector<4x256xi1>, vector<4x256xf32>
    %cst_14 = arith.constant dense<0.000000e+00> : vector<8x256xf32>
    %55 = tpu.matmul %38, %54, %cst_14 {dimension_numbers = #tpu.dot_dimension_numbers<[1], [0], [0], [1], [0, 0, 1, 1], [], []>} : vector<8x4xf32>, vector<4x256xf32>, vector<8x256xf32> -> vector<8x256xf32>
    %56 = tpu.concatenate %1, %1, %1, %1 in 1 : vector<8x64xf32>, vector<8x64xf32>, vector<8x64xf32>, vector<8x64xf32> -> vector<8x256xf32>
    %57 = arith.mulf %55, %56 : vector<8x256xf32>
    %c0_15 = arith.constant 0 : index
    %c0_16 = arith.constant 0 : index
    %58 = vector.load %arg3[%c0_15, %c0_16] : memref<8x256xf32, #tpu.memory_space<vmem>>, vector<8x256xf32>
    tpu.vector_store %arg3[%c0_15, %c0_16], %57 {strides = array<i32>} : memref<8x256xf32, #tpu.memory_space<vmem>>, vector<8x256xf32>,
    return
  }
  func.func @transform_0(%arg0: i32) -> (i32, i32) {
    %c0_i32 = arith.constant 0 : i32
    %c0_i32_0 = arith.constant 0 : i32
    %c0_i32_1 = arith.constant 0 : i32
    return %c0_i32, %c0_i32_0 : i32, i32
  }
  func.func @transform_1(%arg0: i32) -> (i32, i32) {
    %c0_i32 = arith.constant 0 : i32
    %c0_i32_0 = arith.constant 0 : i32
    %c0_i32_1 = arith.constant 0 : i32
    return %c0_i32, %c0_i32_0 : i32, i32
  }
  func.func @transform_2(%arg0: i32) -> (i32, i32) {
    %c0_i32 = arith.constant 0 : i32
    %c0_i32_0 = arith.constant 0 : i32
    return %c0_i32, %arg0 : i32, i32
  }
}

</mosaic_0001>

<bundles_post_ra>
// kernel: tpu_custom_call.1
= control target key start
LH: loop header
LB: loop body
LE: loop exit
PB: predicated region body
PF: predicated region fallthrough
CT: control target
= control target key end

     0   :  { %7 = vsyncpa [#allocation3], 0  ;;  %s695_s0 = inlined_call_operand.hbm [shape: f32[8,64], index: 0, kind: input, shape index: {}]   ;;  %s696_s1 = inlined_call_operand.hbm [shape: f32[10,9], index: 1, kind: input, shape index: {}]   ;;  %s697_s2 = inlined_call_operand.hbm [shape: f32[8,256], index: 2, kind: output, shape index: {}]  }
   0x1   :  { %8 = vsyncpa [#allocation6], 0 }
   0x2   :  { %9 = vsyncpa [#allocation4], 0  ;;  %s612_s9 = smov [#allocation2]   ;;  %s613_s11 = smov [#allocation5]  }
   0x3   :  { %s16_s10 = sshll.u32 %s612_s9, 4  ;;  %s25_s12 = sshll.u32 %s613_s11, 4  ;;  %s17_s10 = int_to_ptr.vmem [resolvable:$true] %s16_s10  ;;  %s26_s12 = int_to_ptr.vmem [resolvable:$true] %s25_s12 }
   0x4   :  { %s554_s13 = scalar_lea.vmem %s17_s10, 128  ;;  %p559_p1 = scmp.lt.s32.totalorder %s17_s10, %s17_s10 }
   0x5   :  { %p555_p0 = scmp.ne.s32.totalorder %s17_s10, %s554_s13  ;;  %p560_p2 = scmp.lt.s32.totalorder %s554_s13, %s554_s13 }
   0x7   :  { %p561_p3 = por %p560_p2, %p559_p1 }
   0x9   :  { %p562_p4 = pnand %p561_p3, %p555_p0 }
   0xb   :  { %565 = shalt.err (!%p562_p4)
}
   0xc   :  { %19 = dma.hbm_to_vmem [thread:$0]  %s695_s0, 128, %s17_s10, [#allocation3]  }
   0xd   :  { %s574_s16 = scalar_lea.vmem %s26_s12, 256  ;;  %p579_p6 = scmp.lt.s32.totalorder %s26_s12, %s26_s12 }
   0xe   :  { %p575_p5 = scmp.ne.s32.totalorder %s26_s12, %s574_s16  ;;  %p580_p7 = scmp.lt.s32.totalorder %s574_s16, %s574_s16 }
  0x10   :  { %p581_p8 = por %p580_p7, %p579_p6 }
  0x12   :  { %p582_p9 = pnand %p581_p8, %p575_p5 }
  0x14   :  { %585 = shalt.err (!%p582_p9)
}
  0x15   :  { %s614_s17 = smov 128   ;;  %s615_s18 = smov 8  }
  0x16   :  { %31 = dma.hbm_to_vmem [thread:$0]  %s696_s1, 256, %s26_s12, [#allocation6], %s614_s17, %s614_s17, %s615_s18  }
  0x17   :  { %606 = dma.done.wait [#allocation3], 128  }
  0x18   :  { %607 = vsyncadd [#allocation3], 4294967168  ;;  %v40_v0 = vlaneseq }
  0x19   :  { %608 = dma.done.wait [#allocation6], 256  }
  0x1a   :  { %609 = vsyncadd [#allocation6], 4294967040  ;;  %v616_v1 = vmov 0.0   ;;  %vm617_vm0 = vmmov 0   ;;  %v647_v2 = vshrl.u32 %v40_v0, 7  ;;  %v649_v3 = vand.u32 127, %v40_v0 }
  0x1b   :  { %495 = vmatprep.subr.mxu0 %v616_v1  ;;  %511 = vmatprep.mubr.msk.f32.mxu0 %vm617_vm0, %v616_v1  ;;  %v618_v12 = vmov 0.0625   ;;  %v671_v15 = vld [vmem:[#allocation2] sm:$0xff]  ;;  %v160_v16 = vld [vmem:[#allocation5] sm:$0xff]  ;;  %v619_v17 = vmov 8   ;;  %v161_v20 = vld [vmem:[#allocation5 + $0x8] sm:$0x3] }
  0x1c   :  { %514 = vmatprep.subr.mxu1 %v616_v1  ;;  %516 = vmatprep.mubr.msk.f32.mxu1 %vm617_vm0, %v616_v1  ;;  %v48_v4 = vadd.s32 56, %v647_v2  ;;  %v51_v5 = vmul.u32 16, %v649_v3  ;;  %v60_v6 = vadd.s32 1, %v649_v3  ;;  %v47_v7 = vadd.s32 48, %v647_v2  ;;  %s621_s0 = smov 64   ;;  %s622_s1 = smov [#allocation7]  }
  0x1d   :  { %v46_v8 = vadd.s32 40, %v647_v2  ;;  %v45_v10 = vadd.s32 32, %v647_v2  ;;  %v44_v11 = vadd.s32 24, %v647_v2  ;;  %v43_v13 = vadd.s32 16, %v647_v2  ;;  %535 = vset.pattern.permute.xlu0 %v619_v17  ;;  %s455_s21 = sshll.u32 %s622_s1, 4  ;;  %s456_s21 = int_to_ptr.vmem [resolvable:$true] %s455_s21 }
  0x1e   :  { %vm59_vm1 = vcmp.ge.s32.totalorder %v48_v4, %v51_v5  ;;  %v61_v9 = vmul.u32 16, %v60_v6  ;;  %vm58_vm2 = vcmp.ge.s32.totalorder %v47_v7, %v51_v5  ;;  %v42_v14 = vadd.s32 8, %v647_v2  ;;  %164 = vperm.xlu0 %535, %v160_v16   ;;  %s586_s22 = scalar_lea.vmem %s456_s21, 256  ;;  %p591_p11 = scmp.lt.s32.totalorder %s456_s21, %s456_s21 }
  0x1f   :  { %vm57_vm5 = vcmp.ge.s32.totalorder %v46_v8, %v51_v5  ;;  %vm56_vm9 = vcmp.ge.s32.totalorder %v45_v10, %v51_v5  ;;  %vm55_vm12 = vcmp.ge.s32.totalorder %v44_v11, %v51_v5  ;;  %vm54_vm15 = vcmp.ge.s32.totalorder %v43_v13, %v51_v5  ;;  %p587_p10 = scmp.ne.s32.totalorder %s456_s21, %s586_s22  ;;  %p592_p12 = scmp.lt.s32.totalorder %s586_s22, %s586_s22 }
  0x20   :  { %vm69_vm3 = vcmp.lt.s32.totalorder %v48_v4, %v61_v9  ;;  %vm68_vm4 = vcmp.lt.s32.totalorder %v47_v7, %v61_v9  ;;  %vm67_vm6 = vcmp.lt.s32.totalorder %v46_v8, %v61_v9  ;;  %vm66_vm10 = vcmp.lt.s32.totalorder %v45_v10, %v61_v9 }
  0x21   :  { %vm77_vm7 = vmand %vm59_vm1, %vm69_vm3  ;;  %vm65_vm13 = vcmp.lt.s32.totalorder %v44_v11, %v61_v9  ;;  %vm64_vm1 = vcmp.lt.s32.totalorder %v43_v13, %v61_v9  ;;  %vm53_vm3 = vcmp.ge.s32.totalorder %v42_v14, %v51_v5  ;;  %v620_v21 = vmov 2   ;;  %p593_p13 = por %p592_p12, %p591_p11 }
  0x22   :  { %496 = vmatpush3.msk.msra.mxu0 %vm77_vm7, %v618_v12  ;;  %vm76_vm8 = vmand %vm58_vm2, %vm68_vm4  ;;  %vm63_vm4 = vcmp.lt.s32.totalorder %v42_v14, %v61_v9  ;;  %vm62_vm7 = vcmp.lt.s32.totalorder %v647_v2, %v61_v9  ;;  %537 = vset.pattern.permute.xlu1 %v620_v21  ;;  %v255_v29 = vrot.slane %v160_v16, 2  ;;  %v256_v30 = vrot.slane %v161_v20, 2 }
  0x23   :  { %497 = vmatprep.subr.mxu0 %v616_v1  ;;  %vm75_vm11 = vmand %vm57_vm5, %vm67_vm6  ;;  %vm52_vm6 = vcmp.ge.s32.totalorder %v647_v2, %v51_v5  ;;  %536 = vset.pattern.permute.xlu0 %v620_v21  ;;  %v345_v34 = vadd.s32 128, %v649_v3  ;;  %v348_v35 = vmul.u32 64, %v647_v2  ;;  %v351_v36 = vadd.s32 1, %v647_v2  ;;  %p594_p0 = pnand %p593_p13, %p587_p10 }
  0x24   :  { %498 = vmatpush3.msk.msra.mxu0 %vm76_vm8, %v618_v12  ;;  %vm74_vm14 = vmand %vm56_vm9, %vm66_vm10  ;;  %vm86_vm10 = vcmask 523264   ;;  %252 = vperm.xlu1 %537, %v161_v20  }
  0x25   :  { %499 = vmatprep.subr.mxu0 %v616_v1  ;;  %vm73_vm2 = vmand %vm55_vm12, %vm65_vm13  ;;  %248 = vperm.xlu0 %536, %v160_v16   ;;  %vm254_vm12 = vcmask 1045504   ;;  %vm262_vm13 = vcmask 15360   ;;  %v352_v37 = vmul.u32 64, %v351_v36 }
  0x26   :  { %500 = vmatpush3.msk.msra.mxu0 %vm75_vm11, %v618_v12  ;;  %vm72_vm5 = vmand %vm54_vm15, %vm64_vm1  ;;  %vm167_vm11 = vcmask 64512   ;;  %v257_v33 = vsel %vm254_vm12, %v255_v29, %v256_v30  ;;  %vm349_vm15 = vcmp.ge.s32.totalorder %v649_v3, %v348_v35 }
  0x27   :  { %501 = vmatprep.subr.mxu0 %v616_v1  ;;  %vm71_vm8 = vmand %vm53_vm3, %vm63_vm4  ;;  %vm354_vm1 = vcmp.lt.s32.totalorder %v345_v34, %v352_v37  ;;  %vm353_vm3 = vcmp.lt.s32.totalorder %v649_v3, %v352_v37 }
  0x28   :  { %502 = vmatpush3.msk.msra.mxu0 %vm74_vm14, %v618_v12  ;;  %vm70_vm9 = vmand %vm52_vm6, %vm62_vm7  ;;  %vm350_vm14 = vcmp.ge.s32.totalorder %v345_v34, %v348_v35  ;;  %441 = vrot.lane.b32.xlu1 %v671_v15, %s621_s0  ;;  %vm359_vm6 = vcmask 31744  }
  0x29   :  { %503 = vmatprep.subr.mxu0 %v616_v1  ;;  %vm356_vm4 = vmand %vm350_vm14, %vm354_vm1 }
  0x2a   :  { %504 = vmatpush3.msk.msra.mxu0 %vm73_vm2, %v618_v12  ;;  %vm363_vm2 = vcmask 1043456   ;;  %v358_v38 = vsel %vm356_vm4, 1.0, %v616_v1 }
  0x2b   :  { %505 = vmatprep.subr.mxu0 %v616_v1 }
  0x2c   :  { %506 = vmatpush3.msk.msra.mxu0 %vm72_vm5, %v618_v12  ;;  %vm355_vm5 = vmand %vm349_vm15, %vm353_vm3 }
  0x2d   :  { %507 = vmatprep.subr.mxu0 %v616_v1  ;;  %v357_v39 = vsel %vm355_vm5, 1.0, %v616_v1 }
  0x2e   :  { %508 = vmatpush3.msk.msra.mxu0 %vm71_vm8, %v618_v12 }
  0x2f   :  { %509 = vmatprep.subr.mxu0 %v616_v1 }
  0x30   :  { %510 = vmatpush3.msk.msra.mxu0 %vm70_vm9, %v618_v12 }
  0x31   :  { %512 = vmatmul.mubr.msk.f32.vlgmr.msra.gmra.mxu0 %vm86_vm10, %v671_v15 }
  0x99   :  { %v165_v22 = vpop.permute.xlu0 %164 }
  0x9f   :  { %v253_v40 = vpop.permute.xlu1 %252 }
  0xa0   :  { %v249_v41 = vpop.permute.xlu0 %248  ;;  %v259_v42 = vrot.slane %v253_v40, 2 }
  0xa1   :  { %v258_v43 = vrot.slane %v249_v41, 2 }
  0xa3   :  { %v260_v44 = vsel %vm254_vm12, %v258_v43, %v259_v42  ;;  %v442_v52 = vpop.permute.xlu1 %441 }
  0xa4   :  { %v444_v53 = vsel %vm86_vm10, %v671_v15, %v442_v52 }
  0xf1   :  { %v156_v18 = vpop.f32.mrf.mxu0 }
  0xf2   :  { %515 = vmatpush3.msra.mxu1 %v156_v18 }
  0xf3   :  { %v513_v19 = vpop.f32.mrf.mxu0  ;;  %517 = vmatmul.mubr.msk.f32.vlgmr.msra.gmra.mxu1 %vm167_vm11, %v160_v16  ;;  %519 = vmatprep.subr.mxu1 %v616_v1 }
  0xf4   :  { %521 = vmatprep.mubr.msk.f32.mxu1 %vm617_vm0, %v616_v1  ;;  %vm265_vm0 = vcmask 1041408  }
 0x1b3   :  { %v236_v23 = vpop.f32.mrf.mxu1 }
 0x1b4   :  { %v237_v24 = vadd.f32 %v236_v23, %v165_v22 }
 0x1b5   :  { %v518_v25 = vpop.f32.mrf.mxu1 }
 0x1b6   :  { %v475_v26 = vmul.f32 -1.442695, %v237_v24 }
 0x1b8   :  { %538 = vpow2.f32 %v475_v26 }
 0x1c5   :  { %v539_v27 = vpop.eup %538 }
 0x1c6   :  { %v243_v28 = vadd.f32 1.0, %v539_v27 }
 0x1c8   :  { %540 = vrcp.f32 %v243_v28 }
 0x1d5   :  { %v541_v31 = vpop.eup %540 }
 0x1d6   :  { %v246_v32 = vmul.f32 %v541_v31, %v237_v24 }
 0x1d8   :  { %520 = vmatpush3.msk.msra.mxu1 %vm265_vm0, %v246_v32 }
 0x1d9   :  { %522 = vmatmul.mubr.msk.f32.vlgmr.msra.gmra.mxu1 %vm262_vm13, %v257_v33  ;;  %479 = vmatprep.subr.msk.mxu1 %vm363_vm2, %v358_v38 }
 0x1da   :  { %434 = vmatprep.mubr.f32.mxu1 %v616_v1  ;;  %480 = vmatpush1.msk.msra.mxu1 %vm363_vm2, %v357_v39 }
 0x299   :  { %v335_v45 = vpop.f32.mrf.mxu1 }
 0x29a   :  { %v336_v46 = vadd.f32 %v335_v45, %v260_v44 }
 0x29b   :  { %v523_v47 = vpop.f32.mrf.mxu1 }
 0x29c   :  { %v478_v48 = vmul.f32 -1.442695, %v336_v46 }
 0x29e   :  { %542 = vpow2.f32 %v478_v48 }
 0x2ab   :  { %v543_v49 = vpop.eup %542 }
 0x2ac   :  { %v342_v50 = vadd.f32 1.0, %v543_v49 }
 0x2ae   :  { %544 = vrcp.f32 %v342_v50 }
 0x2bb   :  { %v545_v51 = vpop.eup %544 }
 0x2bc   :  { %481 = vmatmul.mubr.msk.f32.vlgmr.msra.gmra.mxu1 %vm359_vm6, %v545_v51 }
 0x37c   :  { %v436_v54 = vpop.f32.mrf.mxu1 }
 0x37d   :  { %v445_v55 = vmul.f32 %v444_v53, %v436_v54 }
 0x37e   :  { %v438_v56 = vpop.f32.mrf.mxu1 }
 0x37f   :  { %v446_v57 = vmul.f32 %v444_v53, %v438_v56  ;;  %447 = vst [vmem:[#allocation7] sm:$0xff] %v445_v55 }
 0x381   :  { %448 = vst [vmem:[#allocation7 + $0x8] sm:$0xff] %v446_v57 }
 0x382   :  { %597 = shalt.err (!%p594_p0)
}
 0x383   :  { %458 = dma.vmem_to_hbm [thread:$0]  %s456_s21, 256, %s697_s2, [#allocation4]  }
 0x384   :  { %610 = dma.done.wait [#allocation4], 256  }
 0x385   :  { %611 = vsyncadd [#allocation4], 4294967040 }
 0x386   :  { %462 = vsyncpa [#allocation3], 1 }
 0x387   :  { %463 = vsyncpa [#allocation6], 1 }
 0x388   :  { %464 = vsyncpa [#allocation4], 1 }

</bundles_post_ra>
